<compile_context>
chip_gen: v5e
topology: v5e:2x2
jax: 0.10.0
libtpu: 0.0.40
codegen_flags: <defaults>
</compile_context>

<pallas_src>
import functools

import jax
import jax.numpy as jnp
from jax.experimental import pallas as pl
from jax.experimental.pallas import tpu as pltpu


def _ffn_kernel(x_ref, w1_ref, b1_ref, w2_ref, b2_ref, o_ref, acc_ref):
    # x_ref : (TM, Dp)   bf16
    # w1_ref: (Dp, TK)   bf16
    # b1_ref: (1, TK)    f32
    # w2_ref: (TK, Dp)   bf16
    # b2_ref: (1, Dp)    f32
    # o_ref : (TM, Dp)   f32
    # acc_ref: (TM, Dp)  f32 VMEM scratch (persistent across the k loop)
    k = pl.program_id(1)

    @pl.when(k == 0)
    def _():
        acc_ref[...] = jnp.zeros_like(acc_ref)

    # First matmul slice: (TM, Dp) x (Dp, TK) -> (TM, TK), f32 accumulate.
    h = jnp.dot(x_ref[...], w1_ref[...], preferred_element_type=jnp.float32)
    h = jnp.maximum(h + b1_ref[...], 0.0)          # bias1 + ReLU in f32
    # dropout (eval mode) -> identity
    # Second matmul slice accumulated into the resident f32 scratch.
    acc_ref[...] += jnp.dot(h.astype(w2_ref.dtype), w2_ref[...],
                            preferred_element_type=jnp.float32)

    @pl.when(k == pl.num_programs(1) - 1)
    def _():
        o_ref[...] = (acc_ref[...] + b2_ref[...]).astype(o_ref.dtype)


def _round_up(v, m):
    return ((v + m - 1) // m) * m


@functools.partial(jax.jit, static_argnames=())
def feed_forward(x, w1, b1, w2, b2):
    """x: (batch, max_len, d_model) f32 -> (batch, max_len, d_model) f32.

    w1: (d_model, d_ff), b1: (d_ff,), w2: (d_ff, d_model), b2: (d_model,)
    (weights stored transposed relative to PyTorch's (out, in) layout).
    """
    batch, max_len, d_model = x.shape
    d_ff = w1.shape[1]
    M = batch * max_len

    # ---- layout: pad features to 128 (lane-dense), tokens to the M tile ----
    Dp = _round_up(d_model, 128)
    Fp = _round_up(d_ff, 128)
    TM = 512 if M >= 512 else _round_up(M, 8)
    M_pad = _round_up(M, TM)
    TK = next(c for c in (512, 256, 128) if Fp % c == 0)

    x2d = x.reshape(M, d_model)
    x_p = jnp.zeros((M_pad, Dp), jnp.bfloat16)
    x_p = x_p.at[:M, :d_model].set(x2d.astype(jnp.bfloat16))
    w1_p = jnp.zeros((Dp, Fp), jnp.bfloat16)
    w1_p = w1_p.at[:d_model, :d_ff].set(w1.astype(jnp.bfloat16))
    b1_p = jnp.zeros((1, Fp), jnp.float32).at[0, :d_ff].set(b1)
    w2_p = jnp.zeros((Fp, Dp), jnp.bfloat16)
    w2_p = w2_p.at[:d_ff, :d_model].set(w2.astype(jnp.bfloat16))
    b2_p = jnp.zeros((1, Dp), jnp.float32).at[0, :d_model].set(b2)

    grid = (M_pad // TM, Fp // TK)

    cost = pl.CostEstimate(
        flops=2 * 2 * M * d_model * d_ff,
        transcendentals=0,
        bytes_accessed=(x2d.size + w1.size + w2.size) * 2
        + (b1.size + b2.size + M * d_model) * 4,
    )

    out_p = pl.pallas_call(
        _ffn_kernel,
        out_shape=jax.ShapeDtypeStruct((M_pad, Dp), jnp.float32),
        grid_spec=pltpu.PrefetchScalarGridSpec(
            num_scalar_prefetch=0,
            grid=grid,
            in_specs=[
                pl.BlockSpec((TM, Dp), lambda i, k: (i, 0)),   # x tile (resident over k)
                pl.BlockSpec((Dp, TK), lambda i, k: (0, k)),   # W1 slice
                pl.BlockSpec((1, TK), lambda i, k: (0, k)),    # b1 slice
                pl.BlockSpec((TK, Dp), lambda i, k: (k, 0)),   # W2 slice
                pl.BlockSpec((1, Dp), lambda i, k: (0, 0)),    # b2 (resident)
            ],
            out_specs=pl.BlockSpec((TM, Dp), lambda i, k: (i, 0)),
            scratch_shapes=[pltpu.VMEM((TM, Dp), jnp.float32)],
        ),
        compiler_params=pltpu.CompilerParams(
            dimension_semantics=("parallel", "arbitrary")),
        cost_estimate=cost,
    )(x_p, w1_p, b1_p, w2_p, b2_p)

    return out_p[:M, :d_model].reshape(batch, max_len, d_model)


def _init_params(key, d_model, d_ff):
    # Mimic nn.Linear default init: U(-1/sqrt(fan_in), 1/sqrt(fan_in)).
    k1, k2, k3, k4 = jax.random.split(key, 4)
    lim1 = 1.0 / (d_model ** 0.5)
    lim2 = 1.0 / (d_ff ** 0.5)
    w1 = jax.random.uniform(k1, (d_model, d_ff), jnp.float32, -lim1, lim1)
    b1 = jax.random.uniform(k2, (d_ff,), jnp.float32, -lim1, lim1)
    w2 = jax.random.uniform(k3, (d_ff, d_model), jnp.float32, -lim2, lim2)
    b2 = jax.random.uniform(k4, (d_model,), jnp.float32, -lim2, lim2)
    return w1, b1, w2, b2


if __name__ == "__main__":
    batch, max_len, d_model, d_ff = 2, 8, 32, 64

    key = jax.random.PRNGKey(0)
    kx, kp = jax.random.split(key)
    x = jax.random.normal(kx, (batch, max_len, d_model), jnp.float32)
    w1, b1, w2, b2 = _init_params(kp, d_model, d_ff)

    out = feed_forward(x, w1, b1, w2, b2)
    out = jax.block_until_ready(out)
    assert out.shape == (batch, max_len, d_model)

    # Reference mirroring the kernel's bf16-operand / f32-accumulate math.
    xr = x.astype(jnp.bfloat16).astype(jnp.float32)
    w1r = w1.astype(jnp.bfloat16).astype(jnp.float32)
    w2r = w2.astype(jnp.bfloat16).astype(jnp.float32)
    h = jnp.maximum(xr @ w1r + b1, 0.0)
    h = h.astype(jnp.bfloat16).astype(jnp.float32)
    ref = h @ w2r + b2
    assert jnp.allclose(out, ref, atol=1e-2, rtol=1e-2), (
        float(jnp.max(jnp.abs(out - ref))))

    print("KERNEL_OK")
</pallas_src>

<mosaic_0001>
module attributes {stable_mosaic.version = 11 : i64} {
  func.func @_ffn_kernel(%arg0: i32, %arg1: i32, %arg2: memref<16x128xbf16, #tpu.memory_space<vmem>>, %arg3: memref<128x128xbf16, #tpu.memory_space<vmem>>, %arg4: memref<1x128xf32, #tpu.memory_space<vmem>>, %arg5: memref<128x128xbf16, #tpu.memory_space<vmem>>, %arg6: memref<1x128xf32, #tpu.memory_space<vmem>>, %arg7: memref<16x128xf32, #tpu.memory_space<vmem>>, %arg8: memref<16x128xf32, #tpu.memory_space<vmem>>) attributes {dimension_semantics = [#tpu.dimension_semantics<parallel>, #tpu.dimension_semantics<arbitrary>], iteration_bounds = array<i64: 1, 1>, scalar_prefetch = 0 : i64, scratch_operands = 1 : i64, tpu.core_type = #tpu.core_type<tc>, window_params = [{transform_indices = @transform_0, window_bounds = array<i64: 16, 128>}, {transform_indices = @transform_1, window_bounds = array<i64: 128, 128>}, {transform_indices = @transform_2, window_bounds = array<i64: 1, 128>}, {transform_indices = @transform_3, window_bounds = array<i64: 128, 128>}, {pipeline_mode = #tpu.pipeline_mode<synchronous>, transform_indices = @transform_4, window_bounds = array<i64: 1, 128>}, {transform_indices = @transform_5, window_bounds = array<i64: 16, 128>}]} {
    %c0_i32 = arith.constant 0 : i32
    %0 = arith.cmpi eq, %arg1, %c0_i32 : i32
    %1 = arith.extui %0 : i1 to i32
    %c0_i32_0 = arith.constant 0 : i32
    %2 = arith.cmpi ne, %1, %c0_i32_0 : i32
    scf.if %2 {
      %cst_16 = arith.constant 0.000000e+00 : f32
      %20 = vector.broadcast %cst_16 : f32 to vector<16x128xf32>
      %c0_17 = arith.constant 0 : index
      %c0_18 = arith.constant 0 : index
      %21 = vector.load %arg8[%c0_17, %c0_18] : memref<16x128xf32, #tpu.memory_space<vmem>>, vector<16x128xf32>
      tpu.vector_store %arg8[%c0_17, %c0_18], %20 {strides = array<i32>} : memref<16x128xf32, #tpu.memory_space<vmem>>, vector<16x128xf32>,
    } else {
    }
    %c0 = arith.constant 0 : index
    %c0_1 = arith.constant 0 : index
    %3 = vector.load %arg2[%c0, %c0_1] : memref<16x128xbf16, #tpu.memory_space<vmem>>, vector<16x128xbf16>
    %c0_2 = arith.constant 0 : index
    %c0_3 = arith.constant 0 : index
    %4 = vector.load %arg3[%c0_2, %c0_3] : memref<128x128xbf16, #tpu.memory_space<vmem>>, vector<128x128xbf16>
    %cst = arith.constant dense<0.000000e+00> : vector<16x128xf32>
    %5 = tpu.matmul %3, %4, %cst {dimension_numbers = #tpu.dot_dimension_numbers<[1], [0], [0], [1], [0, 0, 1, 1], [], []>} : vector<16x128xbf16>, vector<128x128xbf16>, vector<16x128xf32> -> vector<16x128xf32>
    %c0_4 = arith.constant 0 : index
    %c0_5 = arith.constant 0 : index
    %6 = vector.load %arg4[%c0_4, %c0_5] : memref<1x128xf32, #tpu.memory_space<vmem>>, vector<1x128xf32>
    %7 = vector.broadcast %6 : vector<1x128xf32> to vector<16x128xf32>
    %8 = arith.addf %5, %7 : vector<16x128xf32>
    %cst_6 = arith.constant 0.000000e+00 : f32
    %9 = vector.broadcast %cst_6 : f32 to vector<16x128xf32>
    %10 = arith.maximumf %8, %9 : vector<16x128xf32>
    %c0_7 = arith.constant 0 : index
    %c0_8 = arith.constant 0 : index
    %11 = vector.load %arg8[%c0_7, %c0_8] : memref<16x128xf32, #tpu.memory_space<vmem>>, vector<16x128xf32>
    %12 = arith.truncf %10 : vector<16x128xf32> to vector<16x128xbf16>
    %c0_9 = arith.constant 0 : index
    %c0_10 = arith.constant 0 : index
    %13 = vector.load %arg5[%c0_9, %c0_10] : memref<128x128xbf16, #tpu.memory_space<vmem>>, vector<128x128xbf16>
    %cst_11 = arith.constant dense<0.000000e+00> : vector<16x128xf32>
    %14 = tpu.matmul %12, %13, %cst_11 {dimension_numbers = #tpu.dot_dimension_numbers<[1], [0], [0], [1], [0, 0, 1, 1], [], []>} : vector<16x128xbf16>, vector<128x128xbf16>, vector<16x128xf32> -> vector<16x128xf32>
    %15 = arith.addf %11, %14 : vector<16x128xf32>
    %c0_12 = arith.constant 0 : index
    %c0_13 = arith.constant 0 : index
    %16 = vector.load %arg8[%c0_12, %c0_13] : memref<16x128xf32, #tpu.memory_space<vmem>>, vector<16x128xf32>
    tpu.vector_store %arg8[%c0_12, %c0_13], %15 {strides = array<i32>} : memref<16x128xf32, #tpu.memory_space<vmem>>, vector<16x128xf32>,
    %c0_i32_14 = arith.constant 0 : i32
    %17 = arith.cmpi eq, %arg1, %c0_i32_14 : i32
    %18 = arith.extui %17 : i1 to i32
    %c0_i32_15 = arith.constant 0 : i32
    %19 = arith.cmpi ne, %18, %c0_i32_15 : i32
    scf.if %19 {
      %c0_16 = arith.constant 0 : index
      %c0_17 = arith.constant 0 : index
      %20 = vector.load %arg8[%c0_16, %c0_17] : memref<16x128xf32, #tpu.memory_space<vmem>>, vector<16x128xf32>
      %c0_18 = arith.constant 0 : index
      %c0_19 = arith.constant 0 : index
      %21 = vector.load %arg6[%c0_18, %c0_19] : memref<1x128xf32, #tpu.memory_space<vmem>>, vector<1x128xf32>
      %22 = vector.broadcast %21 : vector<1x128xf32> to vector<16x128xf32>
      %23 = arith.addf %20, %22 : vector<16x128xf32>
      %c0_20 = arith.constant 0 : index
      %c0_21 = arith.constant 0 : index
      %24 = vector.load %arg7[%c0_20, %c0_21] : memref<16x128xf32, #tpu.memory_space<vmem>>, vector<16x128xf32>
      tpu.vector_store %arg7[%c0_20, %c0_21], %23 {strides = array<i32>} : memref<16x128xf32, #tpu.memory_space<vmem>>, vector<16x128xf32>,
    } else {
    }
    return
  }
  func.func @transform_0(%arg0: i32, %arg1: i32) -> (i32, i32) {
    %c0_i32 = arith.constant 0 : i32
    %c0_i32_0 = arith.constant 0 : i32
    return %arg0, %c0_i32 : i32, i32
  }
  func.func @transform_1(%arg0: i32, %arg1: i32) -> (i32, i32) {
    %c0_i32 = arith.constant 0 : i32
    %c0_i32_0 = arith.constant 0 : i32
    return %c0_i32, %arg1 : i32, i32
  }
  func.func @transform_2(%arg0: i32, %arg1: i32) -> (i32, i32) {
    %c0_i32 = arith.constant 0 : i32
    %c0_i32_0 = arith.constant 0 : i32
    return %c0_i32, %arg1 : i32, i32
  }
  func.func @transform_3(%arg0: i32, %arg1: i32) -> (i32, i32) {
    %c0_i32 = arith.constant 0 : i32
    %c0_i32_0 = arith.constant 0 : i32
    return %arg1, %c0_i32 : i32, i32
  }
  func.func @transform_4(%arg0: i32, %arg1: i32) -> (i32, i32) {
    %c0_i32 = arith.constant 0 : i32
    %c0_i32_0 = arith.constant 0 : i32
    %c0_i32_1 = arith.constant 0 : i32
    return %c0_i32, %c0_i32_0 : i32, i32
  }
  func.func @transform_5(%arg0: i32, %arg1: i32) -> (i32, i32) {
    %c0_i32 = arith.constant 0 : i32
    %c0_i32_0 = arith.constant 0 : i32
    return %arg0, %c0_i32 : i32, i32
  }
}

</mosaic_0001>

<bundles_post_ra>
// kernel: feed_forward.1
= control target key start
LH: loop header
LB: loop body
LE: loop exit
PB: predicated region body
PF: predicated region fallthrough
CT: control target
= control target key end

     0   :  { %s400_s1 = inlined_call_operand.vmem [shape: bf16[128,128], index: 1, kind: input, shape index: {}]   ;;  %s401_s3 = inlined_call_operand.vmem [shape: bf16[128,128], index: 3, kind: input, shape index: {}]   ;;  %s402_s2 = inlined_call_operand.vmem [shape: f32[1,128], index: 2, kind: input, shape index: {}]   ;;  %s403_s0 = inlined_call_operand.vmem [shape: bf16[16,128], index: 0, kind: input, shape index: {}]   ;;  %s404_s4 = inlined_call_operand.vmem [shape: f32[1,128], index: 4, kind: input, shape index: {}]   ;;  %s405_s5 = inlined_call_operand.vmem [shape: f32[16,128], index: 5, kind: output, shape index: {}]  }
   0x1   :  { %v296_v0 = vld [vmem:[%s400_s1 + $0x38] sm:$0xff]  ;;  %v295_v1 = vld [vmem:[%s400_s1 + $0x30] sm:$0xff]  ;;  %v294_v4 = vld [vmem:[%s400_s1 + $0x28] sm:$0xff] }
   0x2   :  { %102 = vmatpush.bf16.msra.mxu0 %v296_v0  ;;  %v304_v2 = vld [vmem:[%s401_s3 + $0x38] sm:$0xff]  ;;  %v303_v3 = vld [vmem:[%s401_s3 + $0x30] sm:$0xff]  ;;  %v302_v5 = vld [vmem:[%s401_s3 + $0x28] sm:$0xff] }
   0x3   :  { %185 = vmatpush.bf16.msra.mxu1 %v304_v2  ;;  %v293_v6 = vld [vmem:[%s400_s1 + $0x20] sm:$0xff]  ;;  %v292_v8 = vld [vmem:[%s400_s1 + $0x18] sm:$0xff]  ;;  %v291_v9 = vld [vmem:[%s400_s1 + $0x10] sm:$0xff] }
   0x4   :  { %v301_v7 = vld [vmem:[%s401_s3 + $0x20] sm:$0xff]  ;;  %v290_v10 = vld [vmem:[%s400_s1 + $0x8] sm:$0xff]  ;;  %v300_v13 = vld [vmem:[%s401_s3 + $0x18] sm:$0xff] }
   0x5   :  { %v289_v11 = vld [vmem:[%s400_s1] sm:$0xff]  ;;  %v299_v14 = vld [vmem:[%s401_s3 + $0x10] sm:$0xff]  ;;  %v298_v15 = vld [vmem:[%s401_s3 + $0x8] sm:$0xff] }
   0x6   :  { %103 = vmatpush.bf16.msra.mxu0 %v295_v1  ;;  %v288_v12 = vld [vmem:[%s403_s0] sm:$0xff] }
   0x7   :  { %186 = vmatpush.bf16.msra.mxu1 %v303_v3  ;;  %v297_v16 = vld [vmem:[%s401_s3] sm:$0xff] }
   0x8   :  { %v305_v18 = vld [vmem:[%s402_s2] ss:$0 sm:$0xff] }
   0x9   :  { %v306_v25 = vld [vmem:[%s404_s4] ss:$0 sm:$0xff] }
   0xa   :  { %104 = vmatpush.bf16.msra.mxu0 %v294_v4 }
   0xb   :  { %187 = vmatpush.bf16.msra.mxu1 %v302_v5 }
   0xe   :  { %105 = vmatpush.bf16.msra.mxu0 %v293_v6 }
   0xf   :  { %188 = vmatpush.bf16.msra.mxu1 %v301_v7 }
  0x12   :  { %106 = vmatpush.bf16.msra.mxu0 %v292_v8 }
  0x13   :  { %189 = vmatpush.bf16.msra.mxu1 %v300_v13 }
  0x16   :  { %107 = vmatpush.bf16.msra.mxu0 %v291_v9 }
  0x17   :  { %190 = vmatpush.bf16.msra.mxu1 %v299_v14 }
  0x1a   :  { %108 = vmatpush.bf16.msra.mxu0 %v290_v10 }
  0x1b   :  { %191 = vmatpush.bf16.msra.mxu1 %v298_v15 }
  0x1e   :  { %109 = vmatpush.bf16.msra.mxu0 %v289_v11 }
  0x1f   :  { %192 = vmatpush.bf16.msra.mxu1 %v297_v16 }
  0x21   :  { %110 = vmatmul.bf16.vlgmr.msra.gmra.mxu0 %v288_v12 }
  0x9e   :  { %v111_v17 = vpop.f32.mrf.mxu0 }
  0x9f   :  { %v112_v19 = vadd.f32 %v305_v18, %v111_v17 }
  0xa1   :  { %v116_v22 = vmax.f32 %v112_v19, 0.0 }
  0xa6   :  { %v113_v20 = vpop.f32.mrf.mxu0 }
  0xa7   :  { %v114_v21 = vadd.f32 %v305_v18, %v113_v20 }
  0xa9   :  { %v117_v23 = vmax.f32 %v114_v21, 0.0 }
  0xab   :  { %v120_v24 = vpack.c.bf16 %v117_v23, %v116_v22 }
  0xad   :  { %193 = vmatmul.bf16.vlgmr.msra.gmra.mxu1 %v120_v24 }
 0x12a   :  { %v194_v26 = vpop.f32.mrf.mxu1 }
 0x12b   :  { %v212_v27 = vadd.f32 %v306_v25, %v194_v26 }
 0x12d   :  { %214 = vst [vmem:[%s405_s5] sm:$0xff] %v212_v27 }
 0x132   :  { %v196_v28 = vpop.f32.mrf.mxu1 }
 0x133   :  { %v213_v29 = vadd.f32 %v306_v25, %v196_v28 }
 0x135   :  { %215 = vst [vmem:[%s405_s5 + $0x8] sm:$0xff] %v213_v29 }

</bundles_post_ra>
